<compile_context>
chip_gen: v7x
topology: tpu7x:2x2x1
jax: 0.10.0
libtpu: 0.0.40
codegen_flags: <defaults>
</compile_context>

<pallas_src>
import math

import jax
import jax.numpy as jnp
from jax import lax
from jax.experimental import pallas as pl
from jax.experimental.pallas import tpu as pltpu

N_HEAD = 4
N_EMBD = 32
HEAD_DIM = N_EMBD // N_HEAD
EPS = 1.1920929e-07          # torch.finfo(float32).eps (F.rms_norm default eps)
NEG_INF = -1e30


def block_kernel(x_ref, cosq_ref, sinq_ref, cosk_ref, sink_ref,
                 wqkv_ref, wo_ref, wfc_ref, wpr_ref, o_ref):
    f32 = jnp.float32
    bf16 = jnp.bfloat16
    C, H, D = N_EMBD, N_HEAD, HEAD_DIM

    x = x_ref[...].astype(f32)                          # (T, C) row-major
    T = x.shape[0]

    def rms_lanes(v):                                   # F.rms_norm over channels
        ms = jnp.mean(v * v, axis=-1, keepdims=True)
        return v * lax.rsqrt(ms + EPS)

    # ---- attention branch: x + c_proj(attn(rms_norm(x))) ----
    h = rms_lanes(x).astype(bf16)
    # qkv^T = wqkv @ h^T expressed as a transposed-operand contraction (MXU
    # handles it natively; no explicit transpose op).
    qkvT = lax.dot_general(wqkv_ref[...], h, (((1,), (1,)), ((), ())),
                           preferred_element_type=f32)  # (3C, T) f32
    # Sublane-group slices + reshapes (D == 8 == f32 sublane tile) are free.
    q3 = qkvT[0 * C:1 * C].reshape(H, D, T)
    k3 = qkvT[1 * C:2 * C].reshape(H, D, T)
    v3 = qkvT[2 * C:3 * C].reshape(H, D, T)

    def head_rms(t3):                                   # per-head RMSNorm (sublane reduce)
        ms = jnp.mean(t3 * t3, axis=1, keepdims=True)
        return t3 * lax.rsqrt(ms + EPS)

    qn3 = head_rms(q3)
    kn3 = head_rms(k3)

    cosq3 = cosq_ref[...].reshape(H, D, T)
    sinq3 = sinq_ref[...].reshape(H, D, T)
    cosk3 = cosk_ref[...].reshape(H, D, T)
    sink3 = sink_ref[...].reshape(H, D, T)

    # RoPE: y = t*cos + halfswap(t)*sin_signed.  The half-swap is a roll by D/2
    # along each head's own size-D axis (4 == -4 mod 8, so direction-free); the
    # sign of the second half and the 1/sqrt(D) q-scale live in the tables.
    qr3 = qn3 * cosq3 + pltpu.roll(qn3, shift=D // 2, axis=1) * sinq3
    kr3 = kn3 * cosk3 + pltpu.roll(kn3, shift=D // 2, axis=1) * sink3

    # scores (H, Tq, Tk): contract the head dim directly (no q transpose).
    s = lax.dot_general(qr3.astype(bf16), kr3.astype(bf16),
                        (((1,), (1,)), ((0,), (0,))),
                        preferred_element_type=f32)

    # Causal mask generated in-kernel (no HBM mask tensor).
    qi = lax.broadcasted_iota(jnp.int32, (H, T, T), 1)
    ki = lax.broadcasted_iota(jnp.int32, (H, T, T), 2)
    s = jnp.where(qi >= ki, s, NEG_INF)

    mx = jnp.max(s, axis=-1, keepdims=True)
    e = jnp.exp(s - mx)
    denom = jnp.sum(e, axis=-1, keepdims=True)
    p = e * pl.reciprocal(denom, approx=True)

    # y^T: (H, D, Tq) head-batched matmul, then merge heads back to channels.
    y3T = lax.dot_general(v3.astype(bf16), p.astype(bf16),
                          (((2,), (2,)), ((0,), (0,))),
                          preferred_element_type=f32)
    yT = y3T.reshape(C, T)

    # Output projection back to row-major: out[t, o] = sum_c yT[c, t]*wo[o, c].
    attn = lax.dot_general(yT.astype(bf16), wo_ref[...],
                           (((0,), (1,)), ((), ())),
                           preferred_element_type=f32)  # (T, C)
    x1 = x + attn

    # ---- MLP branch: x1 + c_proj(relu(c_fc(rms_norm(x1)))^2) ----
    h2 = rms_lanes(x1).astype(bf16)
    fc = lax.dot_general(h2, wfc_ref[...], (((1,), (1,)), ((), ())),
                         preferred_element_type=f32)    # (T, 4C)
    m = jnp.maximum(fc, 0.0)
    m = (m * m).astype(bf16)                            # relu(x)^2
    out = x1 + lax.dot_general(m, wpr_ref[...], (((1,), (1,)), ((), ())),
                               preferred_element_type=f32)

    o_ref[...] = out.astype(o_ref.dtype)


@jax.jit
def block_forward(x, params):
    B, T, C = x.shape
    assert C == N_EMBD
    H, D = N_HEAD, HEAD_DIM
    f32, bf16 = jnp.float32, jnp.bfloat16
    wq, wk, wv, wo, wfc, wpr = params                   # native PyTorch (out, in)

    # Rotary tables (bf16 cache round-trip like the PyTorch Rotary module),
    # channel-major (C, T); the second half of each head carries -sin (so the
    # in-kernel swap needs no sign flip) and the q-side tables absorb the
    # 1/sqrt(HEAD_DIM) attention scale.
    inv_freq = 1.0 / (10000.0 ** (jnp.arange(0, D, 2, dtype=f32) / D))
    freqs = jnp.outer(jnp.arange(T, dtype=f32), inv_freq)            # (T, D/2)
    cos = jnp.cos(freqs).astype(bf16).astype(f32)
    sin = jnp.sin(freqs).astype(bf16).astype(f32)
    cos_head = jnp.concatenate([cos, cos], axis=1).T                  # (D, T)
    sin_head = jnp.concatenate([sin, -sin], axis=1).T                 # (D, T)
    cos_full = jnp.tile(cos_head, (H, 1))                             # (C, T)
    sin_full = jnp.tile(sin_head, (H, 1))                             # (C, T)
    scale = 1.0 / math.sqrt(D)
    cosq, sinq = cos_full * scale, sin_full * scale
    cosk, sink = cos_full, sin_full

    # Fused QKV weight (out, in) = (3C, C), bf16 for the MXU fast path.
    wqkv = jnp.concatenate([wq, wk, wv], axis=0).astype(bf16)

    def const_spec(shape):
        return pl.BlockSpec(shape, lambda b: (0,) * len(shape))

    flops = 24 * B * T * C * C + 4 * B * T * T * C
    transcendentals = B * (H * T * T + 2 * T + 3 * H * T)
    bytes_accessed = (2 * B * T * C * 4        # activations in + out (f32)
                      + 12 * C * C * 2         # weights (bf16), fetched once
                      + 4 * C * T * 4)         # rope tables (f32)

    out = pl.pallas_call(
        block_kernel,
        grid=(B,),
        in_specs=[
            pl.BlockSpec((None, T, C), lambda b: (b, 0, 0)),   # x, per batch
            const_spec((C, T)), const_spec((C, T)),            # cosq, sinq
            const_spec((C, T)), const_spec((C, T)),            # cosk, sink
            const_spec((3 * C, C)),                            # wqkv
            const_spec((C, C)),                                # wo
            const_spec((4 * C, C)),                            # wfc
            const_spec((C, 4 * C)),                            # wpr
        ],
        out_specs=pl.BlockSpec((None, T, C), lambda b: (b, 0, 0)),
        out_shape=jax.ShapeDtypeStruct((B, T, C), x.dtype),
        compiler_params=pltpu.CompilerParams(
            dimension_semantics=("parallel",),                 # megacore on v7x
            vmem_limit_bytes=32 * 1024 * 1024),                # < v7x 64 MiB physical
        cost_estimate=pl.CostEstimate(flops=flops,
                                      transcendentals=transcendentals,
                                      bytes_accessed=bytes_accessed),
    )(x, cosq, sinq, cosk, sink, wqkv,
      wo.astype(bf16), wfc.astype(bf16), wpr.astype(bf16))
    return out


def block_reference(x, params):
    # Pure-JAX reference of the PyTorch forward, for verification.
    wq, wk, wv, wo, wfc, wpr = params
    B, T, C = x.shape
    H, D = N_HEAD, HEAD_DIM
    inv_freq = 1.0 / (10000.0 ** (jnp.arange(0, D, 2, dtype=jnp.float32) / D))
    freqs = jnp.outer(jnp.arange(T, dtype=jnp.float32), inv_freq)
    cos = jnp.cos(freqs).astype(jnp.bfloat16).astype(jnp.float32)[None, :, None, :]
    sin = jnp.sin(freqs).astype(jnp.bfloat16).astype(jnp.float32)[None, :, None, :]

    def rmsn(v):
        return v * jax.lax.rsqrt(jnp.mean(v * v, axis=-1, keepdims=True) + EPS)

    h = rmsn(x)
    q = (h @ wq.T).reshape(B, T, H, D)
    k = (h @ wk.T).reshape(B, T, H, D)
    v = (h @ wv.T).reshape(B, T, H, D)
    q, k = rmsn(q), rmsn(k)

    def rope(t):
        dd = D // 2
        x1, x2 = t[..., :dd], t[..., dd:]
        return jnp.concatenate([x1 * cos + x2 * sin, -x1 * sin + x2 * cos], -1)

    q, k = rope(q), rope(k)
    scores = jnp.einsum('bthd,bshd->bhts', q, k) / math.sqrt(D)
    mask = jnp.tril(jnp.ones((T, T), dtype=bool))
    scores = jnp.where(mask, scores, -jnp.inf)
    p = jax.nn.softmax(scores, axis=-1)
    y = jnp.einsum('bhts,bshd->bthd', p, v).reshape(B, T, C)
    x1 = x + y @ wo.T
    h2 = rmsn(x1)
    m = jnp.maximum(h2 @ wfc.T, 0.0) ** 2
    return x1 + m @ wpr.T


if __name__ == "__main__":
    key = jax.random.PRNGKey(0)
    kx, kq, kk, kv, ko, kf, kp = jax.random.split(key, 7)
    B, T, C = 2, 8, N_EMBD

    x = jax.random.normal(kx, (B, T, C), dtype=jnp.float32)

    # nn.Linear weights in native PyTorch (out, in) orientation.
    # NOTE: the PyTorch module zero-inits both c_proj weights (which would make
    # the block an identity map); small random values exercise the full path.
    s = 0.02
    wq = s * jax.random.normal(kq, (C, C), jnp.float32)
    wk = s * jax.random.normal(kk, (C, C), jnp.float32)
    wv = s * jax.random.normal(kv, (C, C), jnp.float32)
    wo = s * jax.random.normal(ko, (C, C), jnp.float32)
    wfc = s * jax.random.normal(kf, (4 * C, C), jnp.float32)
    wpr = s * jax.random.normal(kp, (C, 4 * C), jnp.float32)
    params = (wq, wk, wv, wo, wfc, wpr)

    out = jax.block_until_ready(block_forward(x, params))
    ref = jax.block_until_ready(block_reference(x, params))

    assert out.shape == x.shape and out.dtype == x.dtype
    assert jnp.allclose(out, ref, atol=2e-2, rtol=2e-2)
    print("KERNEL_OK")
</pallas_src>

<mosaic_0001>
module attributes {stable_mosaic.version = 11 : i64} {
  func.func @block_kernel(%arg0: i32, %arg1: memref<1x8x32xf32, #tpu.memory_space<vmem>>, %arg2: memref<32x8xf32, #tpu.memory_space<vmem>>, %arg3: memref<32x8xf32, #tpu.memory_space<vmem>>, %arg4: memref<32x8xf32, #tpu.memory_space<vmem>>, %arg5: memref<32x8xf32, #tpu.memory_space<vmem>>, %arg6: memref<96x32xbf16, #tpu.memory_space<vmem>>, %arg7: memref<32x32xbf16, #tpu.memory_space<vmem>>, %arg8: memref<128x32xbf16, #tpu.memory_space<vmem>>, %arg9: memref<32x128xbf16, #tpu.memory_space<vmem>>, %arg10: memref<1x8x32xf32, #tpu.memory_space<vmem>>) attributes {dimension_semantics = [#tpu.dimension_semantics<parallel>], iteration_bounds = array<i64: 2>, scalar_prefetch = 0 : i64, scratch_operands = 0 : i64, tpu.core_type = #tpu.core_type<tc>, window_params = [{transform_indices = @transform_0, window_bounds = array<i64: 1, 8, 32>}, {pipeline_mode = #tpu.pipeline_mode<synchronous>, transform_indices = @transform_1, window_bounds = array<i64: 32, 8>}, {pipeline_mode = #tpu.pipeline_mode<synchronous>, transform_indices = @transform_2, window_bounds = array<i64: 32, 8>}, {pipeline_mode = #tpu.pipeline_mode<synchronous>, transform_indices = @transform_3, window_bounds = array<i64: 32, 8>}, {pipeline_mode = #tpu.pipeline_mode<synchronous>, transform_indices = @transform_4, window_bounds = array<i64: 32, 8>}, {pipeline_mode = #tpu.pipeline_mode<synchronous>, transform_indices = @transform_5, window_bounds = array<i64: 96, 32>}, {pipeline_mode = #tpu.pipeline_mode<synchronous>, transform_indices = @transform_6, window_bounds = array<i64: 32, 32>}, {pipeline_mode = #tpu.pipeline_mode<synchronous>, transform_indices = @transform_7, window_bounds = array<i64: 128, 32>}, {pipeline_mode = #tpu.pipeline_mode<synchronous>, transform_indices = @transform_8, window_bounds = array<i64: 32, 128>}, {transform_indices = @transform_9, window_bounds = array<i64: 1, 8, 32>}]} {
    %c0 = arith.constant 0 : index
    %c0_0 = arith.constant 0 : index
    %c0_1 = arith.constant 0 : index
    %0 = vector.load %arg1[%c0, %c0_0, %c0_1] : memref<1x8x32xf32, #tpu.memory_space<vmem>>, vector<1x8x32xf32>
    %1 = vector.shape_cast %0 : vector<1x8x32xf32> to vector<8x32xf32>
    %2 = arith.mulf %1, %1 : vector<8x32xf32>
    %cst = arith.constant dense<0.000000e+00> : vector<8xf32>
    %3 = vector.multi_reduction <add>, %2, %cst [1] : vector<8x32xf32> to vector<8xf32>
    %4 = vector.shape_cast %3 : vector<8xf32> to vector<8x1xf32>
    %cst_2 = arith.constant 3.200000e+01 : f32
    %5 = vector.broadcast %cst_2 : f32 to vector<8x1xf32>
    %6 = arith.divf %4, %5 : vector<8x1xf32>
    %cst_3 = arith.constant 1.1920929E-7 : f32
    %7 = vector.broadcast %cst_3 : f32 to vector<8x1xf32>
    %8 = arith.addf %6, %7 : vector<8x1xf32>
    %9 = math.rsqrt %8 : vector<8x1xf32>
    %10 = vector.broadcast %9 : vector<8x1xf32> to vector<8x32xf32>
    %11 = arith.mulf %1, %10 : vector<8x32xf32>
    %12 = arith.truncf %11 : vector<8x32xf32> to vector<8x32xbf16>
    %c0_4 = arith.constant 0 : index
    %c0_5 = arith.constant 0 : index
    %13 = vector.load %arg6[%c0_4, %c0_5] : memref<96x32xbf16, #tpu.memory_space<vmem>>, vector<96x32xbf16>
    %cst_6 = arith.constant dense<0.000000e+00> : vector<96x8xf32>
    %14 = tpu.matmul %13, %12, %cst_6 {dimension_numbers = #tpu.dot_dimension_numbers<[1], [1], [0], [0], [0, 0, 1, 0], [], []>} : vector<96x32xbf16>, vector<8x32xbf16>, vector<96x8xf32> -> vector<96x8xf32>
    %15 = vector.extract_strided_slice %14 {offsets = [0, 0], sizes = [32, 8], strides = [1, 1]} : vector<96x8xf32> to vector<32x8xf32>
    %16 = vector.shape_cast %15 : vector<32x8xf32> to vector<4x8x8xf32>
    %17 = vector.extract_strided_slice %14 {offsets = [32, 0], sizes = [32, 8], strides = [1, 1]} : vector<96x8xf32> to vector<32x8xf32>
    %18 = vector.shape_cast %17 : vector<32x8xf32> to vector<4x8x8xf32>
    %19 = vector.extract_strided_slice %14 {offsets = [64, 0], sizes = [32, 8], strides = [1, 1]} : vector<96x8xf32> to vector<32x8xf32>
    %20 = vector.shape_cast %19 : vector<32x8xf32> to vector<4x8x8xf32>
    %21 = arith.mulf %16, %16 : vector<4x8x8xf32>
    %cst_7 = arith.constant dense<0.000000e+00> : vector<4x8xf32>
    %22 = vector.multi_reduction <add>, %21, %cst_7 [1] : vector<4x8x8xf32> to vector<4x8xf32>
    %23 = vector.shape_cast %22 : vector<4x8xf32> to vector<4x1x8xf32>
    %cst_8 = arith.constant 8.000000e+00 : f32
    %24 = vector.broadcast %cst_8 : f32 to vector<4x1x8xf32>
    %25 = arith.divf %23, %24 : vector<4x1x8xf32>
    %cst_9 = arith.constant 1.1920929E-7 : f32
    %26 = vector.broadcast %cst_9 : f32 to vector<4x1x8xf32>
    %27 = arith.addf %25, %26 : vector<4x1x8xf32>
    %28 = math.rsqrt %27 : vector<4x1x8xf32>
    %29 = vector.broadcast %28 : vector<4x1x8xf32> to vector<4x8x8xf32>
    %30 = arith.mulf %16, %29 : vector<4x8x8xf32>
    %31 = arith.mulf %18, %18 : vector<4x8x8xf32>
    %cst_10 = arith.constant dense<0.000000e+00> : vector<4x8xf32>
    %32 = vector.multi_reduction <add>, %31, %cst_10 [1] : vector<4x8x8xf32> to vector<4x8xf32>
    %33 = vector.shape_cast %32 : vector<4x8xf32> to vector<4x1x8xf32>
    %cst_11 = arith.constant 8.000000e+00 : f32
    %34 = vector.broadcast %cst_11 : f32 to vector<4x1x8xf32>
    %35 = arith.divf %33, %34 : vector<4x1x8xf32>
    %cst_12 = arith.constant 1.1920929E-7 : f32
    %36 = vector.broadcast %cst_12 : f32 to vector<4x1x8xf32>
    %37 = arith.addf %35, %36 : vector<4x1x8xf32>
    %38 = math.rsqrt %37 : vector<4x1x8xf32>
    %39 = vector.broadcast %38 : vector<4x1x8xf32> to vector<4x8x8xf32>
    %40 = arith.mulf %18, %39 : vector<4x8x8xf32>
    %c0_13 = arith.constant 0 : index
    %c0_14 = arith.constant 0 : index
    %41 = vector.load %arg2[%c0_13, %c0_14] : memref<32x8xf32, #tpu.memory_space<vmem>>, vector<32x8xf32>
    %42 = vector.shape_cast %41 : vector<32x8xf32> to vector<4x8x8xf32>
    %c0_15 = arith.constant 0 : index
    %c0_16 = arith.constant 0 : index
    %43 = vector.load %arg3[%c0_15, %c0_16] : memref<32x8xf32, #tpu.memory_space<vmem>>, vector<32x8xf32>
    %44 = vector.shape_cast %43 : vector<32x8xf32> to vector<4x8x8xf32>
    %c0_17 = arith.constant 0 : index
    %c0_18 = arith.constant 0 : index
    %45 = vector.load %arg4[%c0_17, %c0_18] : memref<32x8xf32, #tpu.memory_space<vmem>>, vector<32x8xf32>
    %46 = vector.shape_cast %45 : vector<32x8xf32> to vector<4x8x8xf32>
    %c0_19 = arith.constant 0 : index
    %c0_20 = arith.constant 0 : index
    %47 = vector.load %arg5[%c0_19, %c0_20] : memref<32x8xf32, #tpu.memory_space<vmem>>, vector<32x8xf32>
    %48 = vector.shape_cast %47 : vector<32x8xf32> to vector<4x8x8xf32>
    %49 = arith.mulf %30, %42 : vector<4x8x8xf32>
    %c4_i32 = arith.constant 4 : i32
    %50 = tpu.dynamic_rotate %30 by %c4_i32 dim 1 : vector<4x8x8xf32>, i32 -> vector<4x8x8xf32>
    %51 = arith.mulf %50, %44 : vector<4x8x8xf32>
    %52 = arith.addf %49, %51 : vector<4x8x8xf32>
    %53 = arith.mulf %40, %46 : vector<4x8x8xf32>
    %c4_i32_21 = arith.constant 4 : i32
    %54 = tpu.dynamic_rotate %40 by %c4_i32_21 dim 1 : vector<4x8x8xf32>, i32 -> vector<4x8x8xf32>
    %55 = arith.mulf %54, %48 : vector<4x8x8xf32>
    %56 = arith.addf %53, %55 : vector<4x8x8xf32>
    %57 = arith.truncf %52 : vector<4x8x8xf32> to vector<4x8x8xbf16>
    %58 = arith.truncf %56 : vector<4x8x8xf32> to vector<4x8x8xbf16>
    %cst_22 = arith.constant dense<0.000000e+00> : vector<4x8x8xf32>
    %59 = tpu.matmul %57, %58, %cst_22 {dimension_numbers = #tpu.dot_dimension_numbers<[1], [1], [2], [2], [0, 0, 0, 2, 1, 2], [0], [0]>} : vector<4x8x8xbf16>, vector<4x8x8xbf16>, vector<4x8x8xf32> -> vector<4x8x8xf32>
    %60 = tpu.iota {dimensions = array<i32: 1>} : vector<4x8x8xi32>
    %61 = tpu.iota {dimensions = array<i32: 2>} : vector<4x8x8xi32>
    %62 = arith.cmpi sge, %60, %61 : vector<4x8x8xi32>
    %cst_23 = arith.constant -1.000000e+30 : f32
    %63 = vector.broadcast %cst_23 : f32 to vector<4x8x8xf32>
    %64 = arith.select %62, %59, %63 : vector<4x8x8xi1>, vector<4x8x8xf32>
    %cst_24 = arith.constant dense<0xFF800000> : vector<4x8xf32>
    %65 = vector.multi_reduction <maximumf>, %64, %cst_24 [2] : vector<4x8x8xf32> to vector<4x8xf32>
    %66 = vector.shape_cast %65 : vector<4x8xf32> to vector<4x8x1xf32>
    %67 = vector.broadcast %66 : vector<4x8x1xf32> to vector<4x8x8xf32>
    %68 = arith.subf %64, %67 : vector<4x8x8xf32>
    %69 = math.exp %68 : vector<4x8x8xf32>
    %cst_25 = arith.constant dense<0.000000e+00> : vector<4x8xf32>
    %70 = vector.multi_reduction <add>, %69, %cst_25 [2] : vector<4x8x8xf32> to vector<4x8xf32>
    %71 = vector.shape_cast %70 : vector<4x8xf32> to vector<4x8x1xf32>
    %72 = tpu.reciprocal %71 {approx = true} : vector<4x8x1xf32> -> vector<4x8x1xf32>
    %73 = vector.broadcast %72 : vector<4x8x1xf32> to vector<4x8x8xf32>
    %74 = arith.mulf %69, %73 : vector<4x8x8xf32>
    %75 = arith.truncf %20 : vector<4x8x8xf32> to vector<4x8x8xbf16>
    %76 = arith.truncf %74 : vector<4x8x8xf32> to vector<4x8x8xbf16>
    %cst_26 = arith.constant dense<0.000000e+00> : vector<4x8x8xf32>
    %77 = tpu.matmul %75, %76, %cst_26 {dimension_numbers = #tpu.dot_dimension_numbers<[2], [2], [1], [1], [0, 0, 0, 1, 1, 1], [0], [0]>} : vector<4x8x8xbf16>, vector<4x8x8xbf16>, vector<4x8x8xf32> -> vector<4x8x8xf32>
    %78 = vector.shape_cast %77 : vector<4x8x8xf32> to vector<32x8xf32>
    %79 = arith.truncf %78 : vector<32x8xf32> to vector<32x8xbf16>
    %c0_27 = arith.constant 0 : index
    %c0_28 = arith.constant 0 : index
    %80 = vector.load %arg7[%c0_27, %c0_28] : memref<32x32xbf16, #tpu.memory_space<vmem>>, vector<32x32xbf16>
    %cst_29 = arith.constant dense<0.000000e+00> : vector<8x32xf32>
    %81 = tpu.matmul %79, %80, %cst_29 {dimension_numbers = #tpu.dot_dimension_numbers<[0], [1], [1], [0], [0, 1, 1, 0], [], []>} : vector<32x8xbf16>, vector<32x32xbf16>, vector<8x32xf32> -> vector<8x32xf32>
    %82 = arith.addf %1, %81 : vector<8x32xf32>
    %83 = arith.mulf %82, %82 : vector<8x32xf32>
    %cst_30 = arith.constant dense<0.000000e+00> : vector<8xf32>
    %84 = vector.multi_reduction <add>, %83, %cst_30 [1] : vector<8x32xf32> to vector<8xf32>
    %85 = vector.shape_cast %84 : vector<8xf32> to vector<8x1xf32>
    %cst_31 = arith.constant 3.200000e+01 : f32
    %86 = vector.broadcast %cst_31 : f32 to vector<8x1xf32>
    %87 = arith.divf %85, %86 : vector<8x1xf32>
    %cst_32 = arith.constant 1.1920929E-7 : f32
    %88 = vector.broadcast %cst_32 : f32 to vector<8x1xf32>
    %89 = arith.addf %87, %88 : vector<8x1xf32>
    %90 = math.rsqrt %89 : vector<8x1xf32>
    %91 = vector.broadcast %90 : vector<8x1xf32> to vector<8x32xf32>
    %92 = arith.mulf %82, %91 : vector<8x32xf32>
    %93 = arith.truncf %92 : vector<8x32xf32> to vector<8x32xbf16>
    %c0_33 = arith.constant 0 : index
    %c0_34 = arith.constant 0 : index
    %94 = vector.load %arg8[%c0_33, %c0_34] : memref<128x32xbf16, #tpu.memory_space<vmem>>, vector<128x32xbf16>
    %cst_35 = arith.constant dense<0.000000e+00> : vector<8x128xf32>
    %95 = tpu.matmul %93, %94, %cst_35 {dimension_numbers = #tpu.dot_dimension_numbers<[1], [1], [0], [0], [0, 0, 1, 0], [], []>} : vector<8x32xbf16>, vector<128x32xbf16>, vector<8x128xf32> -> vector<8x128xf32>
    %cst_36 = arith.constant 0.000000e+00 : f32
    %96 = vector.broadcast %cst_36 : f32 to vector<8x128xf32>
    %97 = arith.maximumf %95, %96 : vector<8x128xf32>
    %98 = arith.mulf %97, %97 : vector<8x128xf32>
    %99 = arith.truncf %98 : vector<8x128xf32> to vector<8x128xbf16>
    %c0_37 = arith.constant 0 : index
    %c0_38 = arith.constant 0 : index
    %100 = vector.load %arg9[%c0_37, %c0_38] : memref<32x128xbf16, #tpu.memory_space<vmem>>, vector<32x128xbf16>
    %cst_39 = arith.constant dense<0.000000e+00> : vector<8x32xf32>
    %101 = tpu.matmul %99, %100, %cst_39 {dimension_numbers = #tpu.dot_dimension_numbers<[1], [1], [0], [0], [0, 0, 1, 0], [], []>} : vector<8x128xbf16>, vector<32x128xbf16>, vector<8x32xf32> -> vector<8x32xf32>
    %102 = arith.addf %82, %101 : vector<8x32xf32>
    %c0_40 = arith.constant 0 : index
    %c0_41 = arith.constant 0 : index
    %c0_42 = arith.constant 0 : index
    %103 = vector.load %arg10[%c0_40, %c0_41, %c0_42] : memref<1x8x32xf32, #tpu.memory_space<vmem>>, vector<1x8x32xf32>
    %104 = vector.shape_cast %103 : vector<1x8x32xf32> to vector<8x32xf32>
    %105 = vector.shape_cast %102 : vector<8x32xf32> to vector<1x8x32xf32>
    tpu.vector_store %arg10[%c0_40, %c0_41, %c0_42], %105 {strides = array<i32>} : memref<1x8x32xf32, #tpu.memory_space<vmem>>, vector<1x8x32xf32>,
    return
  }
  func.func @transform_0(%arg0: i32) -> (i32, i32, i32) {
    %c0_i32 = arith.constant 0 : i32
    %c0_i32_0 = arith.constant 0 : i32
    %c0_i32_1 = arith.constant 0 : i32
    return %arg0, %c0_i32, %c0_i32_0 : i32, i32, i32
  }
  func.func @transform_1(%arg0: i32) -> (i32, i32) {
    %c0_i32 = arith.constant 0 : i32
    %c0_i32_0 = arith.constant 0 : i32
    %c0_i32_1 = arith.constant 0 : i32
    return %c0_i32, %c0_i32_0 : i32, i32
  }
  func.func @transform_2(%arg0: i32) -> (i32, i32) {
    %c0_i32 = arith.constant 0 : i32
    %c0_i32_0 = arith.constant 0 : i32
    %c0_i32_1 = arith.constant 0 : i32
    return %c0_i32, %c0_i32_0 : i32, i32
  }
  func.func @transform_3(%arg0: i32) -> (i32, i32) {
    %c0_i32 = arith.constant 0 : i32
    %c0_i32_0 = arith.constant 0 : i32
    %c0_i32_1 = arith.constant 0 : i32
    return %c0_i32, %c0_i32_0 : i32, i32
  }
  func.func @transform_4(%arg0: i32) -> (i32, i32) {
    %c0_i32 = arith.constant 0 : i32
    %c0_i32_0 = arith.constant 0 : i32
    %c0_i32_1 = arith.constant 0 : i32
    return %c0_i32, %c0_i32_0 : i32, i32
  }
  func.func @transform_5(%arg0: i32) -> (i32, i32) {
    %c0_i32 = arith.constant 0 : i32
    %c0_i32_0 = arith.constant 0 : i32
    %c0_i32_1 = arith.constant 0 : i32
    return %c0_i32, %c0_i32_0 : i32, i32
  }
  func.func @transform_6(%arg0: i32) -> (i32, i32) {
    %c0_i32 = arith.constant 0 : i32
    %c0_i32_0 = arith.constant 0 : i32
    %c0_i32_1 = arith.constant 0 : i32
    return %c0_i32, %c0_i32_0 : i32, i32
  }
  func.func @transform_7(%arg0: i32) -> (i32, i32) {
    %c0_i32 = arith.constant 0 : i32
    %c0_i32_0 = arith.constant 0 : i32
    %c0_i32_1 = arith.constant 0 : i32
    return %c0_i32, %c0_i32_0 : i32, i32
  }
  func.func @transform_8(%arg0: i32) -> (i32, i32) {
    %c0_i32 = arith.constant 0 : i32
    %c0_i32_0 = arith.constant 0 : i32
    %c0_i32_1 = arith.constant 0 : i32
    return %c0_i32, %c0_i32_0 : i32, i32
  }
  func.func @transform_9(%arg0: i32) -> (i32, i32, i32) {
    %c0_i32 = arith.constant 0 : i32
    %c0_i32_0 = arith.constant 0 : i32
    %c0_i32_1 = arith.constant 0 : i32
    return %arg0, %c0_i32, %c0_i32_0 : i32, i32, i32
  }
}

</mosaic_0001>

<bundles_post_ra>
// kernel: block_forward.1
= control target key start
LH: loop header
LB: loop body
LE: loop exit
PB: predicated region body
PF: predicated region fallthrough
CT: control target
= control target key end

     0   :  { %14 = vsyncpa [#allocation3], 0  ;;  %s2240_s0 = inlined_call_operand.vmem [shape: f32[2,8,32], index: 0, kind: input, shape index: {}]   ;;  %s2241_s1 = inlined_call_operand.vmem [shape: f32[32,8], index: 1, kind: input, shape index: {}]   ;;  %s2242_s2 = inlined_call_operand.vmem [shape: f32[32,8], index: 2, kind: input, shape index: {}]   ;;  %s2243_s3 = inlined_call_operand.vmem [shape: f32[32,8], index: 3, kind: input, shape index: {}]   ;;  %s2244_s4 = inlined_call_operand.vmem [shape: f32[32,8], index: 4, kind: input, shape index: {}]   ;;  %s2245_s5 = inlined_call_operand.vmem [shape: bf16[96,32], index: 5, kind: input, shape index: {}]   ;;  %s2246_s6 = inlined_call_operand.vmem [shape: bf16[32,32], index: 6, kind: input, shape index: {}]   ;;  %s2247_s7 = inlined_call_operand.vmem [shape: bf16[128,32], index: 7, kind: input, shape index: {}]   ;;  %s2248_s8 = inlined_call_operand.vmem [shape: bf16[32,128], index: 8, kind: input, shape index: {}]   ;;  %s2249_s9 = inlined_call_operand.hbm [shape: f32[2,8,32], index: 9, kind: output, shape index: {}]  }
   0x1   :  { %16 = vsyncpa [#allocation3 + $0x1], 0  ;;  %s1875_s30 = smov 0   ;;  %s1877_s10 = smov 0  }
   0x2   :  { %s1879_s11 = smov 0   ;;  %s1881_s12 = smov 0  }
   0x3 LB: > { %s1896_s13 = sadd.s32 4294967295, %s1820_s12   ;;  %s1481_s14 = sadd.s32 4294967294, %s1820_s12   ;;  %s1820_s12 = sphi %s1881_s12, %s2255_s12   ;;  %s1816_s11 = sphi %s1879_s11, %s2254_s11   ;;  %s1812_s10 = sphi %s1877_s10, %s2253_s10   ;;  %s1808_s30 = sphi %s1875_s30, %s2252_s30  }
   0x4   : > { %s1900_s15 = sadd.s32 1, %s1820_s12   ;;  %s223_s16 = sadd.s32 1, %s1816_s11 }
   0x5   : > { %s220_s17 = ssub.s32 %s1820_s12, %s1900_s15  ;;  %p233_p0 = scmp.ne.s32.totalorder %s1816_s11, %s1812_s10 }
   0x6   : > { %p221_p1 = scmp.eq.s32.totalorder %s220_s17, 0  ;;  %p234_p2 = scmp.eq.s32.totalorder %s1896_s13, 1 }
   0x7   : > { %p239_p3 = scmp.ne.s32.totalorder %s1812_s10, %s1808_s30  ;;  %p240_p4 = scmp.eq.s32.totalorder %s1481_s14, 1 }
   0x8   : > { %s1911_s18 = scalar_select %p221_p1, %s1816_s11, %s223_s16  }
   0x9   : > { %p1913_p5 = por %p234_p2, %p233_p0  ;;  %p1917_p6 = por %p240_p4, %p239_p3 }
   0xa   : > { %p1484_p7 = scmp.ge.s32.totalorder %s1820_s12, 1  ;;  %p289_p8 = scmp.lt.s32.totalorder %s1820_s12, 3 }
   0xc   : > { %p290_p9 = pnand %p1484_p7, %p289_p8 }
   0xd   : > { %p324_p10 = scmp.lt.s32.totalorder (!%p290_p9), %s1896_s13, 1  ;;  %vm331_vm0 = vcmask (!%p290_p9), 261120   ;;  %v1704_v3 = vld [vmem:[%s2245_s5] sm:$0xff] (!%p290_p9)   ;;  %v1705_v11 = vld [vmem:[%s2245_s5 + $0x8] sm:$0xff] (!%p290_p9)   ;;  %v1706_v12 = vld [vmem:[%s2245_s5 + $0x10] sm:$0xff] (!%p290_p9)   ;;  %v1822_v16 = vmov (!%p290_p9), 0.0  }
   0xe   : > { %293 = sbr.rel (%p290_p9) target bundleno = 2244 (0x8c4), region = 56  ;;  %1565 = vmatprep.mubr.msk.bf16.mxu0 (!%p290_p9), %vm331_vm0, %v1704_v3  ;;  %v1707_v13 = vld [vmem:[%s2245_s5 + $0x18] sm:$0xff] (!%p290_p9)   ;;  %v1708_v14 = vld [vmem:[%s2245_s5 + $0x20] sm:$0xff] (!%p290_p9)   ;;  %v1709_v15 = vld [vmem:[%s2245_s5 + $0x28] sm:$0xff] (!%p290_p9)   ;;  %1589 = vmatprep.subr.bf16.mxu1 (!%p290_p9), %v1822_v16  ;;  %vm1823_vm1 = vmmov (!%p290_p9), 0   ;;  %vm489_vm2 = vcmask (!%p290_p9), 64512  }
   0xf   : > { %1591 = vmatprep.mubr.msk.bf16.mxu1 (!%p290_p9), %vm1823_vm1, %v1822_v16  ;;  %vm658_vm3 = vcmask (!%p290_p9), 1043456   ;;  %s1522_s24 = sshll.u32 (!%p290_p9), %s1896_s13, 7  ;;  %s1824_s16 = smov (!%p290_p9), [#allocation2]  }
  0x10   : > { %s2197_s29 = scalar_lea.hbm (!%p290_p9), %s2249_s9, %s1522_s24  ;;  %s1762_s17 = sshll.u32 (!%p290_p9), %s1824_s16, 4  ;;  %s1763_s17 = int_to_ptr.vmem [resolvable:$false] %s1762_s17 }
  0x15   : > { %s325_s21 = scalar_select %p324_p10, %s1896_s13, 1 }
  0x17   : > { %s1486_s22 = sshll.u32 %s325_s21, 3  ;;  %s1764_s21 = scalar_lea.vmem %s1763_s17, 256 }
  0x18   : > { %s327_s25 = scalar_lea.vmem %s2240_s0, %s1486_s22  ;;  %s321_s22 = sand.u32 1, %s1812_s10  }
  0x19   : > { %v1928_v0 = vld [vmem:[%s327_s25] sm:$0xff]  ;;  %s1485_s23 = sshll.u32 %s321_s22, 3  ;;  %s1409_s13 = scalar_lea.sflag [#allocation3], %s321_s22 }
  0x1a   : > { %v330_v1 = vmul.f32 %v1928_v0, %v1928_v0  ;;  %s323_s25 = scalar_lea.vmem [#allocation2], %s1485_s23 }
  0x1b   : > { %s1422_s26 = sshll.u32 %s323_s25, 4  ;;  %s2199_s26 = int_to_ptr.vmem [resolvable:$true] %s1422_s26 }
  0x1c   : > { %v332_v2 = vsel %vm331_vm0, %v330_v1, 0.0  ;;  %s1758_s14 = scalar_lea.vmem %s2199_s26, 128  ;;  %p1765_p0 = scmp.lt.s32.totalorder %s2199_s26, %s1763_s17 }
  0x1d   : > { %333 = vadd.xlane.f32.xlu0 %v332_v2  ;;  %p1759_p11 = scmp.ne.s32.totalorder %s2199_s26, %s1758_s14  ;;  %p1766_p1 = scmp.lt.s32.totalorder %s1764_s21, %s1758_s14 }
  0x1f   : > { %p1760_p12 = pnand %p1759_p11, %p1913_p5  ;;  %p1767_p2 = por %p1766_p1, %p1765_p0 }
  0x21   : > { %p1761_p13 = pneg %p1760_p12 }
  0x23   : > { %p1768_p3 = pnand %p1767_p2, %p1761_p13 }
  0xaa   : > { %v334_v4 = vpop.xlane.xlu0 %333 }
  0xab   : > { %v336_v5 = vmul.f32 0.03125, %v334_v4 }
  0xad   : > { %v337_v6 = vadd.f32 1.1920929e-07, %v336_v5 }
  0xaf   : > { %1722 = vrsqrt.f32 %v337_v6 }
  0xb9   : > { %v1723_v7 = vpop.eup %1722 }
  0xba   : > { %v339_v8 = vmul.f32 %v1723_v7, %v1928_v0 }
  0xbc   : > { %v340_v9 = vpack.c.bf16 %v339_v8, %v339_v8 }
  0xbe   : > { %1661 = vmatprep.subr.msk.bf16.mxu0 %vm331_vm0, %v340_v9  ;;  %v402_v10 = vsel %vm331_vm0, %v340_v9, 0 }
  0xbf   : > { %1564 = vmatpush3.bf16.xpose.msra.mxu0 %v402_v10 }
  0xc0   : > { %1577 = vmatprep.subr.bf16.mxu0 %v1822_v16 }
  0xc6   : > { %1566 = vmatmul.mubr.msk.bf16.vlgmr.msra.gmra.mrb[0].mxu0 %vm331_vm0, %v1705_v11 }
  0xc7   : > { %1569 = vmatprep.mubr.msk.bf16.mxu0 %vm331_vm0, %v1706_v12 }
  0xce   : > { %1570 = vmatmul.mubr.msk.bf16.gmra.mrb[4].mxu0 %vm331_vm0, %v1707_v13 }
  0xcf   : > { %1573 = vmatprep.mubr.msk.bf16.mxu0 %vm331_vm0, %v1708_v14 }
  0xd6   : > { %1574 = vmatmul.mubr.msk.bf16.gmra.mrb[8].mxu0 %vm331_vm0, %v1709_v15 }
  0xd7   : > { %1579 = vmatprep.mubr.msk.bf16.mxu0 %vm1823_vm1, %v1822_v16 }
 0x199   : > { %v1966_v17 = vpop.f32.mrb[0].mxu0 }
 0x19a   : > { %v487_v18 = vmul.f32 %v1966_v17, %v1966_v17  ;;  %v1970_v19 = vpop.f32.mrb[1].mxu0 }
 0x19b   : > { %v485_v20 = vmul.f32 %v1970_v19, %v1970_v19  ;;  %v1974_v21 = vpop.f32.mrb[2].mxu0 }
 0x19c   : > { %v504_v22 = vsel %vm489_vm2, %v487_v18, 0.0  ;;  %v488_v23 = vmul.f32 %v1974_v21, %v1974_v21  ;;  %v1979_v24 = vpop.f32.mrb[3].mxu0 }
 0x19d   : > { %v505_v25 = vrot.slane %v504_v22, 4  ;;  %v490_v26 = vsel %vm489_vm2, %v485_v20, 0.0  ;;  %v486_v27 = vmul.f32 %v1979_v24, %v1979_v24 }
 0x19e   : > { %v491_v28 = vrot.slane %v490_v26, 4  ;;  %v511_v29 = vsel %vm489_vm2, %v488_v23, 0.0 }
 0x19f   : > { %v506_v30 = vadd.f32 %v505_v25, %v504_v22  ;;  %v512_v31 = vrot.slane %v511_v29, 4  ;;  %v497_v32 = vsel %vm489_vm2, %v486_v27, 0.0 }
 0x1a0   : > { %v492_v33 = vadd.f32 %v491_v28, %v490_v26  ;;  %v498_v34 = vrot.slane %v497_v32, 4 }
 0x1a1   : > { %v507_v35 = vrot.slane %v506_v30, 2  ;;  %v513_v36 = vadd.f32 %v512_v31, %v511_v29  ;;  %v1986_v37 = vpop.f32.mrb[4].mxu0 }
 0x1a2   : > { %v493_v38 = vrot.slane %v492_v33, 2  ;;  %v499_v39 = vadd.f32 %v498_v34, %v497_v32  ;;  %v537_v40 = vmul.f32 %v1986_v37, %v1986_v37  ;;  %v1990_v41 = vpop.f32.mrb[5].mxu0 }
 0x1a3   : > { %v508_v42 = vadd.f32 %v507_v35, %v506_v30  ;;  %v514_v43 = vrot.slane %v513_v36, 2  ;;  %v535_v44 = vmul.f32 %v1990_v41, %v1990_v41  ;;  %v1994_v45 = vpop.f32.mrb[6].mxu0 }
 0x1a4   : > { %v494_v46 = vadd.f32 %v493_v38, %v492_v33  ;;  %v500_v47 = vrot.slane %v499_v39, 2  ;;  %v553_v48 = vsel %vm489_vm2, %v537_v40, 0.0  ;;  %v538_v49 = vmul.f32 %v1994_v45, %v1994_v45  ;;  %v1999_v50 = vpop.f32.mrb[7].mxu0 }
 0x1a5   : > { %v509_v51 = vrot.slane %v508_v42, 1  ;;  %v515_v52 = vadd.f32 %v514_v43, %v513_v36  ;;  %v554_v53 = vrot.slane %v553_v48, 4  ;;  %v539_v54 = vsel %vm489_vm2, %v535_v44, 0.0 }
 0x1a6   : > { %v495_v55 = vrot.slane %v494_v46, 1  ;;  %v501_v56 = vadd.f32 %v500_v47, %v499_v39  ;;  %v540_v57 = vrot.slane %v539_v54, 4  ;;  %v560_v58 = vsel %vm489_vm2, %v538_v49, 0.0 }
 0x1a7   : > { %v510_v59 = vadd.f32 %v509_v51, %v508_v42  ;;  %v516_v60 = vrot.slane %v515_v52, 1  ;;  %v555_v61 = vadd.f32 %v554_v53, %v553_v48  ;;  %v561_v62 = vrot.slane %v560_v58, 4 }
 0x1a8   : > { %v496_v63 = vadd.f32 %v495_v55, %v494_v46  ;;  %v502_v1 = vrot.slane %v501_v56, 1  ;;  %v541_v2 = vadd.f32 %v540_v57, %v539_v54  ;;  %v536_v3 = vmul.f32 %v1999_v50, %v1999_v50  ;;  %v583_v57 = vld [vmem:[%s2241_s1] sm:$0xff] }
 0x1a9   : > { %v521_v4 = vmul.f32 0.125, %v510_v59  ;;  %v517_v5 = vadd.f32 %v516_v60, %v515_v52  ;;  %v556_v6 = vrot.slane %v555_v61, 2  ;;  %v562_v7 = vadd.f32 %v561_v62, %v560_v58  ;;  %v587_v58 = vld [vmem:[%s2242_s2] sm:$0xff]  ;;  %v584_v62 = vld [vmem:[%s2241_s1 + $0x8] sm:$0xff] }
 0x1aa   : > { %v519_v8 = vmul.f32 0.125, %v496_v63  ;;  %v503_v9 = vadd.f32 %v502_v1, %v501_v56  ;;  %v542_v10 = vrot.slane %v541_v2, 2  ;;  %v546_v11 = vsel %vm489_vm2, %v536_v3, 0.0  ;;  %v588_v63 = vld [vmem:[%s2242_s2 + $0x8] sm:$0xff]  ;;  %v585_v1 = vld [vmem:[%s2241_s1 + $0x10] sm:$0xff] }
 0x1ab   : > { %v525_v12 = vadd.f32 1.1920929e-07, %v521_v4  ;;  %v522_v13 = vmul.f32 0.125, %v517_v5  ;;  %v557_v14 = vadd.f32 %v556_v6, %v555_v61  ;;  %v563_v15 = vrot.slane %v562_v7, 2 }
 0x1ac   : > { %v523_v18 = vadd.f32 1.1920929e-07, %v519_v8  ;;  %v520_v20 = vmul.f32 0.125, %v503_v9  ;;  %v543_v22 = vadd.f32 %v542_v10, %v541_v2  ;;  %v547_v23 = vrot.slane %v546_v11, 4  ;;  %v593_v9 = vld [vmem:[%s2243_s3 + $0x10] sm:$0xff] }
 0x1ad   : > { %1724 = vrsqrt.f32 %v525_v12  ;;  %v526_v25 = vadd.f32 1.1920929e-07, %v522_v13  ;;  %v558_v26 = vrot.slane %v557_v14, 1  ;;  %v564_v27 = vadd.f32 %v563_v15, %v562_v7  ;;  %v591_v13 = vld [vmem:[%s2243_s3] sm:$0xff] }
 0x1ae   : > { %1726 = vrsqrt.f32 %v523_v18  ;;  %v524_v28 = vadd.f32 1.1920929e-07, %v520_v20  ;;  %v544_v29 = vrot.slane %v543_v22, 1  ;;  %v548_v30 = vadd.f32 %v547_v23, %v546_v11  ;;  %v594_v23 = vld [vmem:[%s2243_s3 + $0x18] sm:$0xff] }
 0x1af   : > { %1728 = vrsqrt.f32 %v526_v25  ;;  %v559_v31 = vadd.f32 %v558_v26, %v557_v14  ;;  %v565_v32 = vrot.slane %v564_v27, 1  ;;  %v590_v14 = vld [vmem:[%s2242_s2 + $0x18] sm:$0xff] }
 0x1b0   : > { %1730 = vrsqrt.f32 %v524_v28  ;;  %v545_v33 = vadd.f32 %v544_v29, %v543_v22  ;;  %v549_v34 = vrot.slane %v548_v30, 2  ;;  %v586_v25 = vld [vmem:[%s2241_s1 + $0x18] sm:$0xff]  ;;  %v595_v28 = vld [vmem:[%s2244_s4] sm:$0xff] }
 0x1b1   : > { %v569_v35 = vmul.f32 0.125, %v559_v31  ;;  %v566_v36 = vadd.f32 %v565_v32, %v564_v27 }
 0x1b2   : > { %v567_v38 = vmul.f32 0.125, %v545_v33  ;;  %v550_v39 = vadd.f32 %v549_v34, %v548_v30  ;;  %v598_v33 = vld [vmem:[%s2244_s4 + $0x18] sm:$0xff] }
 0x1b3   : > { %v573_v40 = vadd.f32 1.1920929e-07, %v569_v35  ;;  %v570_v42 = vmul.f32 0.125, %v566_v36 }
 0x1b4   : > { %v571_v43 = vadd.f32 1.1920929e-07, %v567_v38  ;;  %v551_v44 = vrot.slane %v550_v39, 1 }
 0x1b5   : > { %1732 = vrsqrt.f32 %v573_v40  ;;  %v574_v46 = vadd.f32 1.1920929e-07, %v570_v42 }
 0x1b6   : > { %1734 = vrsqrt.f32 %v571_v43  ;;  %v552_v47 = vadd.f32 %v551_v44, %v550_v39 }
 0x1b7   : > { %v1725_v48 = vpop.eup %1724  ;;  %1736 = vrsqrt.f32 %v574_v46 }
 0x1b8   : > { %v1727_v49 = vpop.eup %1726  ;;  %v533_v51 = vmul.f32 %v1725_v48, %v1966_v17  ;;  %v568_v52 = vmul.f32 0.125, %v552_v47 }
 0x1b9   : > { %v1729_v53 = vpop.eup %1728  ;;  %v531_v54 = vmul.f32 %v1727_v49, %v1970_v19  ;;  %v589_v19 = vld [vmem:[%s2242_s2 + $0x10] sm:$0xff] }
 0x1ba   : > { %v1731_v55 = vpop.eup %1730  ;;  %v605_v56 = vrot.slane %v533_v51, 4  ;;  %v572_v59 = vadd.f32 1.1920929e-07, %v568_v52  ;;  %v534_v61 = vmul.f32 %v1729_v53, %v1974_v21  ;;  %v601_v11 = vmul.f32 %v585_v1, %v533_v51  ;;  %v596_v52 = vld [vmem:[%s2244_s4 + $0x8] sm:$0xff] }
 0x1bb   : > { %v603_v60 = vrot.slane %v531_v54, 4  ;;  %v532_v17 = vmul.f32 %v1731_v55, %v1979_v24  ;;  %v599_v21 = vmul.f32 %v583_v57, %v531_v54 }
 0x1bc   : > { %1738 = vrsqrt.f32 %v572_v59  ;;  %v609_v3 = vmul.f32 %v605_v56, %v589_v19  ;;  %v606_v5 = vrot.slane %v534_v61, 4  ;;  %v602_v39 = vmul.f32 %v586_v25, %v534_v61 }
 0x1bd   : > { %v604_v2 = vrot.slane %v532_v17, 4  ;;  %v607_v24 = vmul.f32 %v603_v60, %v587_v58  ;;  %v600_v7 = vmul.f32 %v584_v62, %v532_v17 }
 0x1be   : > { %v613_v29 = vadd.f32 %v609_v3, %v601_v11  ;;  %v610_v34 = vmul.f32 %v606_v5, %v590_v14 }
 0x1bf   : > { %v1733_v4 = vpop.eup %1732  ;;  %v611_v6 = vadd.f32 %v607_v24, %v599_v21  ;;  %v608_v8 = vmul.f32 %v604_v2, %v588_v63  ;;  %v2068_v63 = vpop.f32.mrb[8].mxu0 }
 0x1c0   : > { %v1735_v10 = vpop.eup %1734  ;;  %v581_v12 = vmul.f32 %v1733_v4, %v1986_v37  ;;  %v597_v37 = vld [vmem:[%s2244_s4 + $0x10] sm:$0xff]  ;;  %v633_v48 = vpack.c.bf16 %v613_v29, %v613_v29  ;;  %v614_v49 = vadd.f32 %v610_v34, %v602_v39  ;;  %v2070_v1 = vpop.f32.mrb[9].mxu0 }
 0x1c1   : > { %v1737_v15 = vpop.eup %1736  ;;  %v631_v18 = vpack.c.bf16 %v611_v6, %v611_v6  ;;  %v612_v20 = vadd.f32 %v608_v8, %v600_v7  ;;  %v579_v22 = vmul.f32 %v1735_v10, %v1990_v41  ;;  %v2072_v21 = vpop.f32.mrb[10].mxu0  ;;  %v888_v6 = vlaneseq }
 0x1c2   : > { %v617_v26 = vmul.f32 %v593_v9, %v581_v12  ;;  %v621_v27 = vrot.slane %v581_v12, 4  ;;  %v582_v41 = vmul.f32 %v1737_v15, %v1994_v45  ;;  %v592_v45 = vld [vmem:[%s2243_s3 + $0x8] sm:$0xff]  ;;  %v634_v60 = vpack.c.bf16 %v614_v49, %v614_v49  ;;  %v2074_v2 = vpop.f32.mrb[11].mxu0 }
 0x1c3   : > { %639 = vxpose.xlu0.c.b16.start.end [1/1] (short) (narrow) %v631_v18, 16  ;;  %v632_v30 = vpack.c.bf16 %v612_v20, %v612_v20  ;;  %v615_v31 = vmul.f32 %v591_v13, %v579_v22  ;;  %v619_v32 = vrot.slane %v579_v22, 4  ;;  %v889_v7 = vshrl.u32 %v888_v6, 7 }
 0x1c4   : > { %v618_v35 = vmul.f32 %v594_v23, %v582_v41  ;;  %v622_v36 = vrot.slane %v582_v41, 4  ;;  %v625_v38 = vmul.f32 %v621_v27, %v597_v37  ;;  %v891_v8 = vand.u32 127, %v888_v6 }
 0x1c5   : > { %702 = vxpose.xlu1.c.b16.start.end [1/1] (short) (narrow) %v632_v30, 16  ;;  %v623_v40 = vmul.f32 %v619_v32, %v595_v28 }
 0x1c6   : > { %v1739_v42 = vpop.eup %1738  ;;  %v626_v43 = vmul.f32 %v622_v36, %v598_v33  ;;  %v629_v44 = vadd.f32 %v625_v38, %v617_v26  ;;  %vm892_vm4 = vcmp.ge.s32.totalorder %v889_v7, %v891_v8 }
 0x1c7   : > { %v627_v46 = vadd.f32 %v623_v40, %v615_v31  ;;  %v580_v47 = vmul.f32 %v1739_v42, %v1999_v50 }
 0x1c8   : > { %v630_v51 = vadd.f32 %v626_v43, %v618_v35  ;;  %v637_v53 = vpack.c.bf16 %v629_v44, %v629_v44 }
 0x1c9   : > { %v616_v54 = vmul.f32 %v592_v45, %v580_v47  ;;  %v620_v55 = vrot.slane %v580_v47, 4  ;;  %764 = vxpose.xlu1.c.b16.start.end [1/1] (short) (narrow) %v633_v48, 16  ;;  %v635_v56 = vpack.c.bf16 %v627_v46, %v627_v46 }
 0x1ca   : > { %v784_v57 = vsel %vm658_vm3, %v637_v53, 0  ;;  %v638_v58 = vpack.c.bf16 %v630_v51, %v630_v51 }
 0x1cb   : > { %v624_v59 = vmul.f32 %v620_v55, %v596_v52  ;;  %v660_v61 = vsel %vm658_vm3, %v635_v56, 0  ;;  %1590 = vmatpush3.bf16.msra.mxu1 %v784_v57 }
 0x1cc   : > { %1578 = vmatpush3.bf16.msra.mxu0 %v660_v61  ;;  %1595 = vmatprep.subr.bf16.mxu1 %v1822_v16  ;;  %v846_v50 = vsel %vm658_vm3, %v638_v58, 0 }
 0x1cd   : > { %v628_v17 = vadd.f32 %v624_v59, %v616_v54  ;;  %826 = vxpose.xlu1.c.b16.start.end [1/1] (short) (narrow) %v634_v60, 16  ;;  %1583 = vmatprep.subr.bf16.mxu0 %v1822_v16 }
 0x1cf   : > { %v636_v19 = vpack.c.bf16 %v628_v17, %v628_v17 }
 0x1d1   : > { %v722_v62 = vsel %vm658_vm3, %v636_v19, 0 }
 0x229   : > { %v647_v24 = vpop.trf.xlu0 }
 0x22a   : > { %1580 = vmatmul.mubr.msk.bf16.vlgmr.msra.gmra.mrb[12].mxu0 %vm489_vm2, %v647_v24 }
 0x22b   : > { %1584 = vmatpush3.bf16.msra.mxu0 %v722_v62  ;;  %v710_v3 = vpop.trf.xlu1  ;;  %1585 = vmatprep.mubr.msk.bf16.mxu0 %vm1823_vm1, %v1822_v16 }
 0x22c   : > { %1601 = vmatprep.subr.bf16.mxu0 %v1822_v16 }
 0x22f   : > { %v772_v4 = vpop.trf.xlu1 }
 0x230   : > { %1592 = vmatmul.mubr.msk.bf16.vlgmr.msra.gmra.mrb[0].mxu1 %vm489_vm2, %v772_v4 }
 0x231   : > { %1596 = vmatpush3.bf16.msra.mxu1 %v846_v50  ;;  %1597 = vmatprep.mubr.msk.bf16.mxu1 %vm1823_vm1, %v1822_v16 }
 0x232   : > { %1586 = vmatmul.mubr.msk.bf16.vlgmr.msra.gmra.mrb[16].mxu0 %vm489_vm2, %v710_v3  ;;  %1607 = vmatprep.subr.bf16.mxu1 %v1822_v16 }
 0x233   : > { %1603 = vmatprep.mubr.msk.bf16.mxu0 %vm1823_vm1, %v1822_v16  ;;  %v834_v5 = vpop.trf.xlu1 }
 0x238   : > { %1598 = vmatmul.mubr.msk.bf16.vlgmr.msra.gmra.mrb[4].mxu1 %vm489_vm2, %v834_v5  ;;  %v941_v5 = vpack.c.bf16 %v2070_v1, %v2070_v1  ;;  %v942_v1 = vpack.c.bf16 %v2074_v2, %v2074_v2  ;;  %v944_v2 = vpack.c.bf16 %v2072_v21, %v2072_v21 }
 0x239   : > { %1609 = vmatprep.mubr.msk.bf16.mxu1 %vm1823_vm1, %v1822_v16 }
 0x2fd   : > { %v696_v9 = vpop.f32.mrb[12].mxu0 }
 0x2fe   : > { %v893_v10 = vsel %vm892_vm4, %v696_v9, -1e+30  ;;  %v1581_v11 = vpop.f32.mrb[13].mxu0 }
 0x2ff   : > { %v699_v12 = vpop.f32.mrb[14].mxu0  ;;  %v897_v13 = vsel %vm489_vm2, %v893_v10, -inf }
 0x300   : > { %898 = vmax.xlane.f32.xlu1 %v897_v13  ;;  %v1582_v14 = vpop.f32.mrb[15].mxu0 }
 0x303   : > { %v820_v15 = vpop.f32.mrb[0].mxu1 }
 0x304   : > { %v1593_v18 = vpop.f32.mrb[1].mxu1  ;;  %v895_v28 = vsel %vm892_vm4, %v820_v15, -1e+30 }
 0x305   : > { %v758_v20 = vpop.f32.mrb[16].mxu0  ;;  %v823_v22 = vpop.f32.mrb[2].mxu1  ;;  %v903_v30 = vsel %vm489_vm2, %v895_v28, -inf  ;;  %v943_v18 = vpack.c.bf16 %v2068_v63, %v2068_v63 }
 0x306   : > { %v894_v23 = vsel %vm892_vm4, %v758_v20, -1e+30  ;;  %v1587_v37 = vpop.f32.mrb[17].mxu0  ;;  %v1594_v25 = vpop.f32.mrb[3].mxu1  ;;  %v1710_v20 = vld [vmem:[%s2246_s6] sm:$0xff]   ;;  %v1711_v22 = vld [vmem:[%s2246_s6 + $0x8] sm:$0xff]  }
 0x307   : > { %v761_v26 = vpop.f32.mrb[18].mxu0  ;;  %v900_v27 = vsel %vm489_vm2, %v894_v23, -inf  ;;  %v1169_v63 = vsel %vm331_vm0, %v1710_v20, 0  ;;  %v1172_v21 = vsel %vm331_vm0, %v1711_v22, 0 }
 0x308   : > { %901 = vmax.xlane.f32.xlu1 %v900_v27  ;;  %v1588_v41 = vpop.f32.mrb[19].mxu0 }
 0x30b   : > { %v882_v29 = vpop.f32.mrb[4].mxu1 }
 0x30c   : > { %v896_v31 = vsel %vm892_vm4, %v882_v29, -1e+30  ;;  %v1599_v32 = vpop.f32.mrb[5].mxu1  ;;  %904 = vmax.xlane.f32.xlu1 %v903_v30 }
 0x30d   : > { %v885_v33 = vpop.f32.mrb[6].mxu1  ;;  %v906_v34 = vsel %vm489_vm2, %v896_v31, -inf }
 0x30e   : > { %v1600_v35 = vpop.f32.mrb[7].mxu1 }
 0x310   : > { %907 = vmax.xlane.f32.xlu1 %v906_v34 }
 0x38d   : > { %v899_v36 = vpop.xlane.xlu1 %898 }
 0x38e   : > { %v909_v38 = vsub.f32 %v893_v10, %v899_v36 }
 0x390   : > { %v913_v39 = vmul.f32 1.442695, %v909_v38 }
 0x392   : > { %1740 = vpow2.f32 %v913_v39 }
 0x395   : > { %v902_v40 = vpop.xlane.xlu1 %901 }
 0x396   : > { %v910_v42 = vsub.f32 %v894_v23, %v902_v40 }
 0x398   : > { %v915_v43 = vmul.f32 1.442695, %v910_v42 }
 0x399   : > { %v905_v45 = vpop.xlane.xlu1 %904 }
 0x39a   : > { %1742 = vpow2.f32 %v915_v43  ;;  %v911_v44 = vsub.f32 %v895_v28, %v905_v45  ;;  %v1712_v43 = vld [vmem:[%s2247_s7] sm:$0xff]  }
 0x39b   : > { %v1284_v45 = vsel %vm331_vm0, %v1712_v43, 0 }
 0x39c   : > { %v1741_v46 = vpop.eup %1740  ;;  %v917_v47 = vmul.f32 1.442695, %v911_v44  ;;  %v1713_v44 = vld [vmem:[%s2247_s7 + $0x8] sm:$0xff]  }
 0x39d   : > { %v908_v48 = vpop.xlane.xlu1 %907  ;;  %v921_v49 = vsel %vm489_vm2, %v1741_v46, 0.0 }
 0x39e   : > { %1744 = vpow2.f32 %v917_v47  ;;  %v912_v51 = vsub.f32 %v896_v31, %v908_v48  ;;  %922 = vadd.xlane.f32.xlu1 %v921_v49  ;;  %v1714_v47 = vld [vmem:[%s2247_s7 + $0x10] sm:$0xff]   ;;  %v1715_v49 = vld [vmem:[%s2247_s7 + $0x18] sm:$0xff]  }
 0x39f   : > { %v1290_v48 = vsel %vm331_vm0, %v1714_v47, 0 }
 0x3a0   : > { %v919_v52 = vmul.f32 1.442695, %v912_v51  ;;  %v1293_v51 = vsel %vm331_vm0, %v1715_v49, 0 }
 0x3a2   : > { %1746 = vpow2.f32 %v919_v52  ;;  %v1716_v52 = vld [vmem:[%s2247_s7 + $0x20] sm:$0xff]  }
 0x3a4   : > { %v1743_v53 = vpop.eup %1742 }
 0x3a5   : > { %v924_v54 = vsel %vm489_vm2, %v1743_v53, 0.0 }
 0x3a6   : > { %925 = vadd.xlane.f32.xlu1 %v924_v54  ;;  %v1717_v54 = vld [vmem:[%s2247_s7 + $0x28] sm:$0xff]  }
 0x3a8   : > { %v1745_v55 = vpop.eup %1744 }
 0x3a9   : > { %v927_v56 = vsel %vm489_vm2, %v1745_v55, 0.0 }
 0x3aa   : > { %928 = vadd.xlane.f32.xlu1 %v927_v56 }
 0x3ac   : > { %v1747_v57 = vpop.eup %1746 }
 0x3ad   : > { %v930_v58 = vsel %vm489_vm2, %v1747_v57, 0.0 }
 0x3ae   : > { %931 = vadd.xlane.f32.xlu0 %v930_v58 }
 0x42b   : > { %v923_v59 = vpop.xlane.xlu1 %922 }
 0x42c   : > { %1748 = vrcp.f32 %v923_v59 }
 0x433   : > { %v926_v60 = vpop.xlane.xlu1 %925 }
 0x434   : > { %1750 = vrcp.f32 %v926_v60 }
 0x436   : > { %v1749_v61 = vpop.eup %1748 }
 0x437   : > { %v929_v50 = vpop.xlane.xlu1 %928  ;;  %v937_v17 = vmul.f32 %v1749_v61, %v1741_v46  ;;  %v1287_v46 = vsel %vm331_vm0, %v1713_v44, 0 }
 0x438   : > { %1752 = vrcp.f32 %v929_v50 }
 0x439   : > { %v945_v19 = vpack.c.bf16 %v937_v17, %v937_v17  ;;  %v1718_v17 = vld [vmem:[%s2247_s7 + $0x30] sm:$0xff]  }
 0x43b   : > { %v932_v62 = vpop.xlane.xlu0 %931  ;;  %v953_v24 = vsel %vm489_vm2, %v945_v19, 0  ;;  %v1302_v19 = vsel %vm331_vm0, %v1718_v17, 0 }
 0x43c   : > { %1754 = vrcp.f32 %v932_v62  ;;  %1602 = vmatpush3.bf16.xpose.msra.mxu0 %v953_v24  ;;  %v1720_v24 = vld [vmem:[%s2248_s8] sm:$0xff]  }
 0x43d   : > { %1613 = vmatprep.subr.bf16.mxu0 %v1822_v16 }
 0x43e   : > { %v1751_v3 = vpop.eup %1750 }
 0x43f   : > { %v938_v4 = vmul.f32 %v1751_v3, %v1743_v53  ;;  %v1296_v53 = vsel %vm331_vm0, %v1716_v52, 0 }
 0x441   : > { %v946_v6 = vpack.c.bf16 %v938_v4, %v938_v4 }
 0x442   : > { %v1753_v7 = vpop.eup %1752 }
 0x443   : > { %1604 = vmatmul.mubr.msk.bf16.vlgmr.msra.gmra.mrb[20].mxu0 %vm489_vm2, %v941_v5  ;;  %v999_v8 = vsel %vm489_vm2, %v946_v6, 0  ;;  %v939_v9 = vmul.f32 %v1753_v7, %v1745_v55  ;;  %v1299_v55 = vsel %vm331_vm0, %v1717_v54, 0 }
 0x444   : > { %1608 = vmatpush3.bf16.xpose.msra.mxu1 %v999_v8  ;;  %1615 = vmatprep.mubr.msk.bf16.mxu0 %vm1823_vm1, %v1822_v16 }
 0x445   : > { %v947_v10 = vpack.c.bf16 %v939_v9, %v939_v9  ;;  %1619 = vmatprep.subr.bf16.mxu1 %v1822_v16  ;;  %v1721_v9 = vld [vmem:[%s2248_s8 + $0x8] sm:$0xff]  }
 0x446   : > { %v1755_v11 = vpop.eup %1754 }
 0x447   : > { %v1045_v12 = vsel %vm489_vm2, %v947_v10, 0  ;;  %v940_v13 = vmul.f32 %v1755_v11, %v1747_v57 }
 0x448   : > { %1614 = vmatpush3.bf16.xpose.msra.mxu0 %v1045_v12 }
 0x449   : > { %v948_v14 = vpack.c.bf16 %v940_v13, %v940_v13  ;;  %1625 = vmatprep.subr.bf16.mxu0 %v1822_v16 }
 0x44b   : > { %1610 = vmatmul.mubr.msk.bf16.vlgmr.msra.gmra.mrb[8].mxu1 %vm489_vm2, %v942_v1  ;;  %v1091_v15 = vsel %vm489_vm2, %v948_v14, 0 }
 0x44c   : > { %1620 = vmatpush3.bf16.xpose.msra.mxu1 %v1091_v15  ;;  %1621 = vmatprep.mubr.msk.bf16.mxu1 %vm1823_vm1, %v1822_v16 }
 0x44d   : > { %1633 = vmatprep.subr.bf16.mxu1 %v1822_v16 }
 0x44f   : > { %1616 = vmatmul.mubr.msk.bf16.vlgmr.msra.gmra.mrb[24].mxu0 %vm489_vm2, %v943_v18 }
 0x450   : > { %1629 = vmatprep.mubr.msk.bf16.mxu0 %vm1823_vm1, %v1822_v16  ;;  %1626 = vmatpush3.bf16.xpose.msra.mxu0 %v1169_v63 }
 0x451   : > { %1627 = vmatprep.subr.bf16.mxu0 %v1822_v16 }
 0x453   : > { %1622 = vmatmul.mubr.msk.bf16.vlgmr.msra.gmra.mrb[12].mxu1 %vm489_vm2, %v944_v2 }
 0x454   : > { %1649 = vmatprep.mubr.msk.bf16.mxu1 %vm1823_vm1, %v1822_v16  ;;  %1634 = vmatpush3.bf16.xpose.msra.mxu1 %v1284_v45 }
 0x455   : > { %1635 = vmatprep.subr.bf16.mxu1 %v1822_v16 }
 0x458   : > { %1628 = vmatpush3.bf16.xpose.msra.mxu0 %v1172_v21 }
 0x459   : > { %1653 = vmatprep.subr.bf16.mxu0 %v1822_v16 }
 0x45c   : > { %1636 = vmatpush3.bf16.xpose.msra.mxu1 %v1287_v46 }
 0x45d   : > { %1637 = vmatprep.subr.bf16.mxu1 %v1822_v16 }
 0x464   : > { %1638 = vmatpush3.bf16.xpose.msra.mxu1 %v1290_v48 }
 0x465   : > { %1639 = vmatprep.subr.bf16.mxu1 %v1822_v16 }
 0x46c   : > { %1640 = vmatpush3.bf16.xpose.msra.mxu1 %v1293_v51 }
 0x46d   : > { %1641 = vmatprep.subr.bf16.mxu1 %v1822_v16 }
 0x474   : > { %1642 = vmatpush3.bf16.xpose.msra.mxu1 %v1296_v53 }
 0x475   : > { %1643 = vmatprep.subr.bf16.mxu1 %v1822_v16 }
 0x47c   : > { %1644 = vmatpush3.bf16.xpose.msra.mxu1 %v1299_v55 }
 0x47d   : > { %1645 = vmatprep.subr.bf16.mxu1 %v1822_v16 }
 0x484   : > { %1646 = vmatpush3.bf16.xpose.msra.mxu1 %v1302_v19 }
 0x485   : > { %1647 = vmatprep.subr.bf16.mxu1 %v1822_v16 }
 0x516   : > { %v989_v23 = vpop.f32.mrb[20].mxu0 }
 0x517   : > { %v1605_v37 = vpop.f32.mrb[21].mxu0 }
 0x518   : > { %v992_v25 = vpop.f32.mrb[22].mxu0 }
 0x519   : > { %v1606_v26 = vpop.f32.mrb[23].mxu0 }
 0x51e   : > { %v1035_v27 = vpop.f32.mrb[8].mxu1 }
 0x51f   : > { %v1133_v28 = vpack.c.bf16 %v1035_v27, %v989_v23  ;;  %v1611_v41 = vpop.f32.mrb[9].mxu1 }
 0x520   : > { %v1038_v29 = vpop.f32.mrb[10].mxu1 }
 0x521   : > { %v1612_v30 = vpop.f32.mrb[11].mxu1  ;;  %1139 = vxpose.xlu1.c.b16.start [1/2] (short) (narrow) %v1133_v28, 16 }
 0x522   : > { %v1081_v31 = vpop.f32.mrb[24].mxu0 }
 0x523   : > { %v1617_v32 = vpop.f32.mrb[25].mxu0 }
 0x524   : > { %v1084_v33 = vpop.f32.mrb[26].mxu0 }
 0x525   : > { %v1618_v34 = vpop.f32.mrb[27].mxu0 }
 0x526   : > { %v1127_v35 = vpop.f32.mrb[12].mxu1 }
 0x527   : > { %v1134_v36 = vpack.c.bf16 %v1127_v35, %v1081_v31  ;;  %v1623_v38 = vpop.f32.mrb[13].mxu1 }
 0x528   : > { %v1130_v39 = vpop.f32.mrb[14].mxu1 }
 0x529   : > { %v1624_v40 = vpop.f32.mrb[15].mxu1  ;;  %1140 = vxpose.xlu1.c.b16.end [2/2] (short) (narrow) %v1134_v36, 16 }
 0x58b   : > { %v1147_v42 = vpop.trf.xlu1 }
 0x58c   : > { %1630 = vmatmul.mubr.msk.bf16.vlgmr.msra.gmra.mrb[28].mxu0 %vm331_vm0, %v1147_v42 }
 0x58d   : > { %1657 = vmatprep.mubr.msk.bf16.mxu0 %vm1823_vm1, %v1822_v16  ;;  %1654 = vmatpush3.bf16.xpose.msra.mxu0 %v1720_v24 }
 0x58e   : > { %1655 = vmatprep.subr.bf16.mxu0 %v1822_v16 }
 0x595   : > { %1656 = vmatpush3.bf16.xpose.msra.mxu0 %v1721_v9 }
 0x65f   : > { %v1208_v56 = vpop.f32.mrb[28].mxu0 }
 0x660   : > { %v1214_v57 = vadd.f32 %v1208_v56, %v1928_v0  ;;  %v1631_v58 = vpop.f32.mrb[29].mxu0  ;;  %v1719_v0 = vld [vmem:[%s2247_s7 + $0x38] sm:$0xff]  }
 0x661   : > { %v1211_v59 = vpop.f32.mrb[30].mxu0  ;;  %v1305_v62 = vsel %vm331_vm0, %v1719_v0, 0 }
 0x662   : > { %v1632_v60 = vpop.f32.mrb[31].mxu0  ;;  %v1215_v61 = vmul.f32 %v1214_v57, %v1214_v57  ;;  %1648 = vmatpush3.bf16.xpose.msra.mxu1 %v1305_v62 }
 0x664   : > { %v1216_v50 = vsel %vm331_vm0, %v1215_v61, 0.0 }
 0x665   : > { %1217 = vadd.xlane.f32.xlu0 %v1216_v50 }
 0x6f2   : > { %v1218_v3 = vpop.xlane.xlu0 %1217 }
 0x6f3   : > { %v1219_v4 = vmul.f32 0.03125, %v1218_v3 }
 0x6f5   : > { %v1220_v5 = vadd.f32 1.1920929e-07, %v1219_v4 }
 0x6f7   : > { %1756 = vrsqrt.f32 %v1220_v5 }
 0x701   : > { %v1757_v6 = vpop.eup %1756 }
 0x702   : > { %v1222_v7 = vmul.f32 %v1757_v6, %v1214_v57 }
 0x704   : > { %v1223_v8 = vpack.c.bf16 %v1222_v7, %v1222_v7 }
 0x706   : > { %1650 = vmatmul.mubr.msk.bf16.vlgmr.msra.gmra.mrb[16].mxu1 %vm331_vm0, %v1223_v8 }
 0x7d9   : > { %v1341_v10 = vpop.f32.mrb[16].mxu1 }
 0x7da   : > { %v1347_v11 = vmax.f32 %v1341_v10, 0.0  ;;  %v1651_v12 = vpop.f32.mrb[17].mxu1 }
 0x7db   : > { %v1344_v16 = vpop.f32.mrb[18].mxu1 }
 0x7dc   : > { %v1348_v13 = vmul.f32 %v1347_v11, %v1347_v11  ;;  %v1652_v1 = vpop.f32.mrb[19].mxu1 }
 0x7de   : > { %v1349_v14 = vpack.c.bf16 %v1348_v13, %v1348_v13 }
 0x7e0   : > { %1658 = vmatmul.mubr.bf16.vlgmr.msra.gmra.mrb[32].mxu0 %v1349_v14 }
 0x8b3   : > { %v1400_v15 = vpop.f32.mrb[32].mxu0 }
 0x8b4   : > { %v1406_v18 = vadd.f32 %v1400_v15, %v1214_v57  ;;  %v1659_v2 = vpop.f32.mrb[33].mxu0 }
 0x8b5   : > { %v1403_v20 = vpop.f32.mrb[34].mxu0 }
 0x8b6   : > { %v1660_v63 = vpop.f32.mrb[35].mxu0  ;;  %1407 = vst.msk [vmem:[%s323_s25] sm:$0xff] %vm331_vm0, %v1406_v18 }
 0x8b7   : > { %1771 = shalt.err (!%p1768_p3)
}
 0x8b8   : > { %s1772_s22 = scalar_lea.hbm %s2197_s29, 128  ;;  %s1776_s25 = scalar_lea.hbm %s2249_s9, 256 }
 0x8b9   : > { %p1773_p4 = scmp.ne.s32.totalorder %s2197_s29, %s1772_s22  ;;  %p1777_p9 = scmp.lt.u32.totalorder %s2197_s29, %s2249_s9 }
 0x8ba   : > { %p1778_p10 = scmp.lt.u32.totalorder %s1776_s25, %s1772_s22  ;;  %p1780_p12 = scmp.lt.u32.totalorder %s1772_s22, %s2197_s29 }
 0x8bb   : > { %p1774_p7 = pnand %p1773_p4, %p1913_p5 }
 0x8bc   : > { %p1779_p11 = por %p1778_p10, %p1777_p9 }
 0x8bd   : > { %p1775_p8 = pneg %p1774_p7 }
 0x8be   : > { %p1781_p13 = por %p1780_p12, %p1779_p11 }
 0x8c0   : > { %p1782_p0 = pnand %p1781_p13, %p1775_p8 }
 0x8c2   : > { %1785 = shalt.err (!%p1782_p0)
}
 0x8c3   : > { %1662 = dma.vmem_to_hbm [thread:$0]  (%p1913_p5), %s2199_s26, 128, %s2197_s29, %s1409_s13  }
 0x8c4 PF: > { %p1668_p1 = scmp.ge.s32.totalorder %s1820_s12, 2  ;;  %s1434_s14 = sand.u32 1, %s1808_s30  }
 0x8c5   : > { %s1435_s16 = scalar_lea.sflag [#allocation3], %s1434_s14 }
 0x8c6   : > { %p1665_p2 = pnand %p1668_p1, %p1917_p6 }
 0x8c8   : > { %1803 = dma.done.wait (!%p1665_p2), %s1435_s16, 128  }
 0x8c9   : > { %1805 = vsyncadd (!%p1665_p2), %s1435_s16, 4294967168  ;;  %p19_p3 = scmp.ge.s32.totalorder %s1900_s15, 4   ;;  %s2252_s30 = smov %s1812_s10 }
 0x8ca   : > { %s2253_s10 = smov %s1816_s11  ;;  %s2254_s11 = smov %s1911_s18 }
 0x8cb   : > { %s2255_s12 = smov %s1900_s15  ;;  %21 = sbr.rel (!%p19_p3) target bundleno = 3 (0x3), region = 91 }
 0x8d2   :  { %1440 = vsyncpa [#allocation3], 1 }
 0x8d3   :  { %1442 = vsyncpa [#allocation3 + $0x1], 1 }

</bundles_post_ra>
